<compile_context>
chip_gen: v5e
topology: v5e:2x2
jax: 0.10.0
libtpu: 0.0.40
codegen_flags: <defaults>
</compile_context>

<pallas_src>
import functools

import jax
import jax.numpy as jnp
from jax.experimental import pallas as pl
from jax.experimental.pallas import tpu as pltpu


def _round_up(x, m):
    return ((x + m - 1) // m) * m


def _ffn_kernel(x_ref, w1_ref, b1_ref, w2_ref, b2_ref, o_ref, acc_ref):
    # x_ref : (tm, model_dim)        w1_ref: (model_dim, tff)   b1_ref: (1, tff)
    # w2_ref: (tff, model_dim)       b2_ref: (1, model_dim)
    # o_ref : (tm, model_dim)        acc_ref: (tm, model_dim) f32 scratch
    ff = pl.program_id(1)

    @pl.when(ff == 0)
    def _():
        acc_ref[...] = jnp.zeros_like(acc_ref)

    # linear_1 on the live d_ff slice (+ its bias slice), SiLU on f32,
    # then accumulate this slice's contribution to linear_2.
    h = (jnp.dot(x_ref[...], w1_ref[...], preferred_element_type=jnp.float32)
         + b1_ref[...])
    h = h * jax.nn.sigmoid(h)  # SiLU
    # dropout -> identity (eval mode)
    acc_ref[...] += jnp.dot(h.astype(w2_ref.dtype), w2_ref[...],
                            preferred_element_type=jnp.float32)

    @pl.when(ff == pl.num_programs(1) - 1)
    def _():
        # b2 is added exactly once, in the reduction epilogue.
        o_ref[...] = (acc_ref[...] + b2_ref[...]).astype(o_ref.dtype)


@functools.partial(jax.jit, static_argnames=("tm", "tff"))
def feed_forward(x, w1, b1, w2, b2, *, tm=256, tff=512):
    """x: (batch, seq, model_dim) -> (batch, seq, model_dim).

    Weights are stored as (in_features, out_features), i.e. transposed vs.
    torch.nn.Linear, so the kernel computes y = x @ W + b directly.
    tm: row-tile (MXU height), tff: streamed d_ff tile (reduction axis).
    """
    batch, seq, model_dim = x.shape
    d_ff = w1.shape[1]
    M = batch * seq

    # --- M (row) tiling: clamp to problem size, keep a multiple of 8, pad. ---
    tm_eff = min(tm, _round_up(M, 8))
    m_pad = _round_up(M, tm_eff)

    # --- d_ff (reduction) tiling: full dim if small, else a multiple of 128. --
    if d_ff <= tff:
        tff_eff = d_ff
        dff_pad = d_ff
    else:
        tff_eff = max(128, (tff // 128) * 128)
        dff_pad = _round_up(d_ff, tff_eff)

    x2d = x.reshape(M, model_dim)
    if m_pad != M:
        x2d = jnp.pad(x2d, ((0, m_pad - M), (0, 0)))
    if dff_pad != d_ff:
        # Zero padding on the d_ff axis is exact: SiLU(0)=0 and W2 pad rows are
        # zero, so padded slices contribute nothing to the accumulator.
        w1 = jnp.pad(w1, ((0, 0), (0, dff_pad - d_ff)))
        b1 = jnp.pad(b1, ((0, dff_pad - d_ff),))
        w2 = jnp.pad(w2, ((0, dff_pad - d_ff), (0, 0)))

    b1_2d = b1.reshape(1, dff_pad)
    b2_2d = b2.reshape(1, model_dim)

    grid = (m_pad // tm_eff, dff_pad // tff_eff)

    itemsize = jnp.dtype(x.dtype).itemsize
    cost = pl.CostEstimate(
        flops=4 * M * model_dim * d_ff,          # two matmuls
        transcendentals=M * d_ff,                # sigmoid in SiLU
        bytes_accessed=(x2d.size + w1.size + w2.size + b1.size + b2.size
                        + M * model_dim) * itemsize,
    )

    out = pl.pallas_call(
        _ffn_kernel,
        out_shape=jax.ShapeDtypeStruct((m_pad, model_dim), x.dtype),
        grid_spec=pltpu.PrefetchScalarGridSpec(
            num_scalar_prefetch=0,
            grid=grid,
            in_specs=[
                pl.BlockSpec((tm_eff, model_dim), lambda i, f: (i, 0)),    # x
                pl.BlockSpec((model_dim, tff_eff), lambda i, f: (0, f)),   # W1
                pl.BlockSpec((1, tff_eff), lambda i, f: (0, f)),           # b1
                pl.BlockSpec((tff_eff, model_dim), lambda i, f: (f, 0)),   # W2
                pl.BlockSpec((1, model_dim), lambda i, f: (0, 0)),         # b2
            ],
            out_specs=pl.BlockSpec((tm_eff, model_dim), lambda i, f: (i, 0)),
            scratch_shapes=[pltpu.VMEM((tm_eff, model_dim), jnp.float32)],
        ),
        compiler_params=pltpu.CompilerParams(
            # M axis parallel (megacore sharding); d_ff reduction arbitrary.
            dimension_semantics=("parallel", "arbitrary"),
            # Raised above the scoped defaults (16/32 MiB), still within the
            # 64 MiB physical VMEM of v7x so this value is portable.
            vmem_limit_bytes=64 * 1024 * 1024,
        ),
        cost_estimate=cost,
    )(x2d, w1, b1_2d, w2, b2_2d)

    return out[:M].reshape(batch, seq, model_dim)


def init_params(key, model_dim, d_ff, dtype=jnp.float32):
    """nn.Linear-style init (uniform +/- 1/sqrt(fan_in)), stored (in, out)."""
    k1, k2, k3, k4 = jax.random.split(key, 4)
    lim1 = 1.0 / (model_dim ** 0.5)
    lim2 = 1.0 / (d_ff ** 0.5)
    w1 = jax.random.uniform(k1, (model_dim, d_ff), dtype, -lim1, lim1)
    b1 = jax.random.uniform(k2, (d_ff,), dtype, -lim1, lim1)
    w2 = jax.random.uniform(k3, (d_ff, model_dim), dtype, -lim2, lim2)
    b2 = jax.random.uniform(k4, (model_dim,), dtype, -lim2, lim2)
    return w1, b1, w2, b2


if __name__ == "__main__":
    key = jax.random.PRNGKey(0)
    k_x, k_p = jax.random.split(key)

    batch, seq, model_dim, d_ff = 2, 8, 32, 128
    x = jax.random.normal(k_x, (batch, seq, model_dim), jnp.float32)
    w1, b1, w2, b2 = init_params(k_p, model_dim, d_ff)

    out = feed_forward(x, w1, b1, w2, b2)
    out = jax.block_until_ready(out)

    # Reference in plain JAX (same eval-mode semantics).
    h_ref = x @ w1 + b1
    h_ref = h_ref * jax.nn.sigmoid(h_ref)
    ref = h_ref @ w2 + b2
    assert out.shape == (batch, seq, model_dim)
    assert jnp.allclose(out, ref, atol=1e-5, rtol=1e-5), "mismatch vs reference"

    print("KERNEL_OK")
</pallas_src>

<mosaic_0001>
module attributes {stable_mosaic.version = 11 : i64} {
  func.func @_ffn_kernel(%arg0: i32, %arg1: i32, %arg2: memref<16x32xf32, #tpu.memory_space<vmem>>, %arg3: memref<32x128xf32, #tpu.memory_space<vmem>>, %arg4: memref<1x128xf32, #tpu.memory_space<vmem>>, %arg5: memref<128x32xf32, #tpu.memory_space<vmem>>, %arg6: memref<1x32xf32, #tpu.memory_space<vmem>>, %arg7: memref<16x32xf32, #tpu.memory_space<vmem>>, %arg8: memref<16x32xf32, #tpu.memory_space<vmem>>) attributes {dimension_semantics = [#tpu.dimension_semantics<parallel>, #tpu.dimension_semantics<arbitrary>], iteration_bounds = array<i64: 1, 1>, scalar_prefetch = 0 : i64, scratch_operands = 1 : i64, tpu.core_type = #tpu.core_type<tc>, window_params = [{transform_indices = @transform_0, window_bounds = array<i64: 16, 32>}, {transform_indices = @transform_1, window_bounds = array<i64: 32, 128>}, {transform_indices = @transform_2, window_bounds = array<i64: 1, 128>}, {transform_indices = @transform_3, window_bounds = array<i64: 128, 32>}, {pipeline_mode = #tpu.pipeline_mode<synchronous>, transform_indices = @transform_4, window_bounds = array<i64: 1, 32>}, {transform_indices = @transform_5, window_bounds = array<i64: 16, 32>}]} {
    %c0_i32 = arith.constant 0 : i32
    %0 = arith.cmpi eq, %arg1, %c0_i32 : i32
    %1 = arith.extui %0 : i1 to i32
    %c0_i32_0 = arith.constant 0 : i32
    %2 = arith.cmpi ne, %1, %c0_i32_0 : i32
    scf.if %2 {
      %cst_16 = arith.constant 0.000000e+00 : f32
      %23 = vector.broadcast %cst_16 : f32 to vector<16x32xf32>
      %c0_17 = arith.constant 0 : index
      %c0_18 = arith.constant 0 : index
      %24 = vector.load %arg8[%c0_17, %c0_18] : memref<16x32xf32, #tpu.memory_space<vmem>>, vector<16x32xf32>
      tpu.vector_store %arg8[%c0_17, %c0_18], %23 {strides = array<i32>} : memref<16x32xf32, #tpu.memory_space<vmem>>, vector<16x32xf32>,
    } else {
    }
    %c0 = arith.constant 0 : index
    %c0_1 = arith.constant 0 : index
    %3 = vector.load %arg2[%c0, %c0_1] : memref<16x32xf32, #tpu.memory_space<vmem>>, vector<16x32xf32>
    %c0_2 = arith.constant 0 : index
    %c0_3 = arith.constant 0 : index
    %4 = vector.load %arg3[%c0_2, %c0_3] : memref<32x128xf32, #tpu.memory_space<vmem>>, vector<32x128xf32>
    %cst = arith.constant dense<0.000000e+00> : vector<16x128xf32>
    %5 = tpu.matmul %3, %4, %cst {dimension_numbers = #tpu.dot_dimension_numbers<[1], [0], [0], [1], [0, 0, 1, 1], [], []>} : vector<16x32xf32>, vector<32x128xf32>, vector<16x128xf32> -> vector<16x128xf32>
    %c0_4 = arith.constant 0 : index
    %c0_5 = arith.constant 0 : index
    %6 = vector.load %arg4[%c0_4, %c0_5] : memref<1x128xf32, #tpu.memory_space<vmem>>, vector<1x128xf32>
    %7 = vector.broadcast %6 : vector<1x128xf32> to vector<16x128xf32>
    %8 = arith.addf %5, %7 : vector<16x128xf32>
    %9 = arith.negf %8 : vector<16x128xf32>
    %10 = math.exp %9 : vector<16x128xf32>
    %cst_6 = arith.constant 1.000000e+00 : f32
    %11 = vector.broadcast %cst_6 : f32 to vector<16x128xf32>
    %12 = arith.addf %11, %10 : vector<16x128xf32>
    %13 = arith.divf %11, %12 : vector<16x128xf32>
    %14 = arith.mulf %8, %13 : vector<16x128xf32>
    %c0_7 = arith.constant 0 : index
    %c0_8 = arith.constant 0 : index
    %15 = vector.load %arg8[%c0_7, %c0_8] : memref<16x32xf32, #tpu.memory_space<vmem>>, vector<16x32xf32>
    %c0_9 = arith.constant 0 : index
    %c0_10 = arith.constant 0 : index
    %16 = vector.load %arg5[%c0_9, %c0_10] : memref<128x32xf32, #tpu.memory_space<vmem>>, vector<128x32xf32>
    %cst_11 = arith.constant dense<0.000000e+00> : vector<16x32xf32>
    %17 = tpu.matmul %14, %16, %cst_11 {dimension_numbers = #tpu.dot_dimension_numbers<[1], [0], [0], [1], [0, 0, 1, 1], [], []>} : vector<16x128xf32>, vector<128x32xf32>, vector<16x32xf32> -> vector<16x32xf32>
    %18 = arith.addf %15, %17 : vector<16x32xf32>
    %c0_12 = arith.constant 0 : index
    %c0_13 = arith.constant 0 : index
    %19 = vector.load %arg8[%c0_12, %c0_13] : memref<16x32xf32, #tpu.memory_space<vmem>>, vector<16x32xf32>
    tpu.vector_store %arg8[%c0_12, %c0_13], %18 {strides = array<i32>} : memref<16x32xf32, #tpu.memory_space<vmem>>, vector<16x32xf32>,
    %c0_i32_14 = arith.constant 0 : i32
    %20 = arith.cmpi eq, %arg1, %c0_i32_14 : i32
    %21 = arith.extui %20 : i1 to i32
    %c0_i32_15 = arith.constant 0 : i32
    %22 = arith.cmpi ne, %21, %c0_i32_15 : i32
    scf.if %22 {
      %c0_16 = arith.constant 0 : index
      %c0_17 = arith.constant 0 : index
      %23 = vector.load %arg8[%c0_16, %c0_17] : memref<16x32xf32, #tpu.memory_space<vmem>>, vector<16x32xf32>
      %c0_18 = arith.constant 0 : index
      %c0_19 = arith.constant 0 : index
      %24 = vector.load %arg6[%c0_18, %c0_19] : memref<1x32xf32, #tpu.memory_space<vmem>>, vector<1x32xf32>
      %25 = vector.broadcast %24 : vector<1x32xf32> to vector<16x32xf32>
      %26 = arith.addf %23, %25 : vector<16x32xf32>
      %c0_20 = arith.constant 0 : index
      %c0_21 = arith.constant 0 : index
      %27 = vector.load %arg7[%c0_20, %c0_21] : memref<16x32xf32, #tpu.memory_space<vmem>>, vector<16x32xf32>
      tpu.vector_store %arg7[%c0_20, %c0_21], %26 {strides = array<i32>} : memref<16x32xf32, #tpu.memory_space<vmem>>, vector<16x32xf32>,
    } else {
    }
    return
  }
  func.func @transform_0(%arg0: i32, %arg1: i32) -> (i32, i32) {
    %c0_i32 = arith.constant 0 : i32
    %c0_i32_0 = arith.constant 0 : i32
    return %arg0, %c0_i32 : i32, i32
  }
  func.func @transform_1(%arg0: i32, %arg1: i32) -> (i32, i32) {
    %c0_i32 = arith.constant 0 : i32
    %c0_i32_0 = arith.constant 0 : i32
    return %c0_i32, %arg1 : i32, i32
  }
  func.func @transform_2(%arg0: i32, %arg1: i32) -> (i32, i32) {
    %c0_i32 = arith.constant 0 : i32
    %c0_i32_0 = arith.constant 0 : i32
    return %c0_i32, %arg1 : i32, i32
  }
  func.func @transform_3(%arg0: i32, %arg1: i32) -> (i32, i32) {
    %c0_i32 = arith.constant 0 : i32
    %c0_i32_0 = arith.constant 0 : i32
    return %arg1, %c0_i32 : i32, i32
  }
  func.func @transform_4(%arg0: i32, %arg1: i32) -> (i32, i32) {
    %c0_i32 = arith.constant 0 : i32
    %c0_i32_0 = arith.constant 0 : i32
    %c0_i32_1 = arith.constant 0 : i32
    return %c0_i32, %c0_i32_0 : i32, i32
  }
  func.func @transform_5(%arg0: i32, %arg1: i32) -> (i32, i32) {
    %c0_i32 = arith.constant 0 : i32
    %c0_i32_0 = arith.constant 0 : i32
    return %arg0, %c0_i32 : i32, i32
  }
}

</mosaic_0001>

<bundles_post_ra>
// kernel: feed_forward.1
= control target key start
LH: loop header
LB: loop body
LE: loop exit
PB: predicated region body
PF: predicated region fallthrough
CT: control target
= control target key end

     0   :  { %s361_s0 = inlined_call_operand.vmem [shape: f32[16,32], index: 0, kind: input, shape index: {}]   ;;  %s362_s1 = inlined_call_operand.vmem [shape: f32[32,128], index: 1, kind: input, shape index: {}]   ;;  %s363_s2 = inlined_call_operand.vmem [shape: f32[1,128], index: 2, kind: input, shape index: {}]   ;;  %s364_s3 = inlined_call_operand.vmem [shape: f32[128,32], index: 3, kind: input, shape index: {}]   ;;  %s365_s4 = inlined_call_operand.vmem [shape: f32[1,32], index: 4, kind: input, shape index: {}]   ;;  %s366_s5 = inlined_call_operand.hbm [shape: f32[16,32], index: 5, kind: output, shape index: {}]  }
   0x1   :  { %v33_v0 = vld [vmem:[%s362_s1 + $0x18] sm:$0xff]  ;;  %v32_v1 = vld [vmem:[%s362_s1 + $0x10] sm:$0xff]  ;;  %v31_v2 = vld [vmem:[%s362_s1 + $0x8] sm:$0xff] }
   0x2   :  { %57 = vmatpush.msra.mxu0 %v33_v0 }
   0x3   :  { %10 = vsyncpa [#allocation4], 0  ;;  %v30_v3 = vld [vmem:[%s362_s1] sm:$0xff]  ;;  %vm25_vm0 = vcmask 261120   ;;  %v29_v5 = vld [vmem:[%s361_s0 + $0x8] sm:$0xff]  ;;  %v244_v28 = vmov 0.0  }
   0x4   :  { %58 = vmatpush.msra.mxu0 %v32_v1  ;;  %v28_v4 = vld [vmem:[%s361_s0] sm:$0xff]  ;;  %v125_v6 = vld [vmem:[%s364_s3 + $0x78] sm:$0xff]  ;;  %v124_v7 = vld [vmem:[%s364_s3 + $0x70] sm:$0xff]  ;;  %26 = vst.msk [vmem:[#allocation2] sm:$0xff] %vm25_vm0, %v244_v28  ;;  %s245_s10 = smov [#allocation3]   ;;  %s172_s14 = sshll.u32 %s366_s5, 4  ;;  %s173_s14 = int_to_ptr.hbm [resolvable:$true] %s172_s14 }
   0x5   :  { %126 = vmatpush.msra.mxu1 %v125_v6  ;;  %188 = vmatpush.msra.mxu2 %v125_v6  ;;  %v123_v8 = vld [vmem:[%s364_s3 + $0x68] sm:$0xff]  ;;  %v122_v9 = vld [vmem:[%s364_s3 + $0x60] sm:$0xff]  ;;  %v121_v10 = vld [vmem:[%s364_s3 + $0x58] sm:$0xff]  ;;  %27 = vst.msk [vmem:[#allocation2 + $0x8] sm:$0xff] %vm25_vm0, %v244_v28  ;;  %s170_s11 = sshll.u32 %s245_s10, 4  ;;  %s247_s15 = smov 8   ;;  %s171_s11 = int_to_ptr.vmem [resolvable:$true] %s170_s11 }
   0x6   :  { %59 = vmatpush.msra.mxu0 %v31_v2  ;;  %v120_v11 = vld [vmem:[%s364_s3 + $0x50] sm:$0xff]  ;;  %v119_v12 = vld [vmem:[%s364_s3 + $0x48] sm:$0xff]  ;;  %v118_v13 = vld [vmem:[%s364_s3 + $0x40] sm:$0xff] }
   0x7   :  { %127 = vmatpush.msra.mxu1 %v124_v7  ;;  %189 = vmatpush.msra.mxu2 %v124_v7  ;;  %v117_v14 = vld [vmem:[%s364_s3 + $0x38] sm:$0xff]  ;;  %v116_v15 = vld [vmem:[%s364_s3 + $0x30] sm:$0xff]  ;;  %v115_v16 = vld [vmem:[%s364_s3 + $0x28] sm:$0xff] }
   0x8   :  { %60 = vmatpush.msra.mxu0 %v30_v3  ;;  %v114_v17 = vld [vmem:[%s364_s3 + $0x20] sm:$0xff]  ;;  %v113_v18 = vld [vmem:[%s364_s3 + $0x18] sm:$0xff]  ;;  %v112_v19 = vld [vmem:[%s364_s3 + $0x10] sm:$0xff] }
   0x9   :  { %184 = vmatmul.msk.f32.vlgmr.msra.gmra.mxu0 %vm25_vm0, %v28_v4  ;;  %128 = vmatpush.msra.mxu1 %v123_v8  ;;  %v111_v20 = vld [vmem:[%s364_s3 + $0x8] sm:$0xff]  ;;  %v208_v21 = vld [vmem:[%s363_s2] ss:$0 sm:$0xff] }
   0xa   :  { %190 = vmatpush.msra.mxu2 %v123_v8  ;;  %v110_v22 = vld [vmem:[%s364_s3] sm:$0xff] }
   0xb   :  { %129 = vmatpush.msra.mxu1 %v122_v9  ;;  %v108_v56 = vld [vmem:[#allocation2] sm:$0xff] }
   0xc   :  { %191 = vmatpush.msra.mxu2 %v122_v9  ;;  %v209_v59 = vld [vmem:[%s365_s4] ss:$0 sm:$0xff]  ;;  %v109_v62 = vld [vmem:[#allocation2 + $0x8] sm:$0xff]  ;;  %s246_s4 = smov 128  }
   0xd   :  { %130 = vmatpush.msra.mxu1 %v121_v10 }
   0xe   :  { %192 = vmatpush.msra.mxu2 %v121_v10 }
   0xf   :  { %131 = vmatpush.msra.mxu1 %v120_v11 }
  0x10   :  { %193 = vmatpush.msra.mxu2 %v120_v11 }
  0x11   :  { %185 = vmatmul.msk.f32.gmra.mxu0 %vm25_vm0, %v29_v5  ;;  %132 = vmatpush.msra.mxu1 %v119_v12 }
  0x12   :  { %194 = vmatpush.msra.mxu2 %v119_v12 }
  0x13   :  { %133 = vmatpush.msra.mxu1 %v118_v13 }
  0x14   :  { %195 = vmatpush.msra.mxu2 %v118_v13 }
  0x15   :  { %134 = vmatpush.msra.mxu1 %v117_v14 }
  0x16   :  { %196 = vmatpush.msra.mxu2 %v117_v14 }
  0x17   :  { %135 = vmatpush.msra.mxu1 %v116_v15 }
  0x18   :  { %197 = vmatpush.msra.mxu2 %v116_v15 }
  0x19   :  { %136 = vmatpush.msra.mxu1 %v115_v16 }
  0x1a   :  { %198 = vmatpush.msra.mxu2 %v115_v16 }
  0x1b   :  { %137 = vmatpush.msra.mxu1 %v114_v17 }
  0x1c   :  { %199 = vmatpush.msra.mxu2 %v114_v17 }
  0x1d   :  { %138 = vmatpush.msra.mxu1 %v113_v18 }
  0x1e   :  { %200 = vmatpush.msra.mxu2 %v113_v18 }
  0x1f   :  { %139 = vmatpush.msra.mxu1 %v112_v19 }
  0x20   :  { %201 = vmatpush.msra.mxu2 %v112_v19 }
  0x21   :  { %140 = vmatpush.msra.mxu1 %v111_v20 }
  0x22   :  { %202 = vmatpush.msra.mxu2 %v111_v20 }
  0x23   :  { %141 = vmatpush.msra.mxu1 %v110_v22 }
  0x24   :  { %203 = vmatpush.msra.mxu2 %v110_v22 }
  0x86   :  { %v62_v23 = vpop.f32.mrf.mxu0 }
  0x87   :  { %v63_v24 = vadd.f32 %v208_v21, %v62_v23 }
  0x89   :  { %v186_v25 = vmul.f32 -1.442695, %v63_v24 }
  0x8b   :  { %210 = vpow2.f32 %v186_v25 }
  0x8e   :  { %v65_v26 = vpop.f32.mrf.mxu0 }
  0x8f   :  { %v66_v27 = vadd.f32 %v208_v21, %v65_v26 }
  0x91   :  { %v211_v29 = vpop.eup %210  ;;  %v187_v30 = vmul.f32 -1.442695, %v66_v27 }
  0x92   :  { %v74_v31 = vadd.f32 1.0, %v211_v29 }
  0x93   :  { %212 = vpow2.f32 %v187_v30 }
  0x94   :  { %214 = vrcp.f32 %v74_v31  ;;  %v87_v37 = vand.u32 2147483648, %v74_v31  ;;  %v85_v39 = vand.u32 2147483647, %v74_v31  ;;  %vm81_vm2 = vweird.f32 %v74_v31 }
  0x96   :  { %v88_v42 = vor.u32 1.1754944e-38, %v87_v37  ;;  %vm86_vm4 = vcmp.eq.f32.partialorder %v85_v39, 8.507059e+37 }
  0x99   :  { %v213_v32 = vpop.eup %212 }
  0x9a   :  { %v215_v33 = vpop.eup %214  ;;  %v75_v34 = vadd.f32 1.0, %v213_v32 }
  0x9b   :  { %v77_v35 = vmul.f32 %v215_v33, %v74_v31  ;;  %vm82_vm1 = vweird.f32 %v215_v33 }
  0x9c   :  { %216 = vrcp.f32 %v75_v34  ;;  %vm83_vm3 = vmor %vm81_vm2, %vm82_vm1  ;;  %v102_v48 = vand.u32 2147483648, %v75_v34  ;;  %v100_v50 = vand.u32 2147483647, %v75_v34  ;;  %vm96_vm6 = vweird.f32 %v75_v34 }
  0x9d   :  { %v78_v36 = vsub.f32 1.0, %v77_v35 }
  0x9e   :  { %v103_v52 = vor.u32 1.1754944e-38, %v102_v48  ;;  %vm101_vm8 = vcmp.eq.f32.partialorder %v100_v50, 8.507059e+37 }
  0x9f   :  { %v79_v38 = vmul.f32 %v215_v33, %v78_v36 }
  0xa1   :  { %v80_v40 = vadd.f32 %v215_v33, %v79_v38 }
  0xa2   :  { %v217_v41 = vpop.eup %216 }
  0xa3   :  { %v84_v43 = vsel %vm83_vm3, %v215_v33, %v80_v40  ;;  %v92_v44 = vmul.f32 %v217_v41, %v75_v34  ;;  %vm97_vm5 = vweird.f32 %v217_v41 }
  0xa4   :  { %v89_v45 = vsel %vm86_vm4, %v88_v42, %v84_v43  ;;  %vm98_vm7 = vmor %vm96_vm6, %vm97_vm5 }
  0xa5   :  { %v106_v46 = vmul.f32 %v89_v45, %v63_v24  ;;  %v93_v47 = vsub.f32 1.0, %v92_v44 }
  0xa7   :  { %142 = vmatmul.f32.vlgmr.msra.gmra.mxu1 %v106_v46  ;;  %v94_v49 = vmul.f32 %v217_v41, %v93_v47 }
  0xa9   :  { %v95_v51 = vadd.f32 %v217_v41, %v94_v49 }
  0xab   :  { %v99_v53 = vsel %vm98_vm7, %v217_v41, %v95_v51 }
  0xac   :  { %v104_v54 = vsel %vm101_vm8, %v103_v52, %v99_v53 }
  0xad   :  { %v107_v55 = vmul.f32 %v104_v54, %v66_v27 }
  0xaf   :  { %145 = vmatmul.f32.vlgmr.msra.gmra.mxu2 %v107_v55 }
 0x124   :  { %v143_v57 = vpop.f32.mrf.mxu1 }
 0x125   :  { %v149_v58 = vadd.f32 %v143_v57, %v108_v56 }
 0x127   :  { %151 = vst.msk [vmem:[#allocation2] sm:$0xff] %vm25_vm0, %v149_v58 }
 0x12e   :  { %v156_v60 = vld [vmem:[#allocation2] sm:$0xff] }
 0x12f   :  { %v162_v61 = vadd.f32 %v209_v59, %v156_v60 }
 0x131   :  { %164 = vst.msk [vmem:[#allocation3] sm:$0xff] %vm25_vm0, %v162_v61 }
 0x132   :  { %v146_v63 = vpop.f32.mrf.mxu2 }
 0x133   :  { %v150_v0 = vadd.f32 %v146_v63, %v109_v62 }
 0x135   :  { %152 = vst.msk [vmem:[#allocation2 + $0x8] sm:$0xff] %vm25_vm0, %v150_v0 }
 0x13c   :  { %v157_v1 = vld [vmem:[#allocation2 + $0x8] sm:$0xff] }
 0x13d   :  { %v163_v2 = vadd.f32 %v209_v59, %v157_v1 }
 0x13f   :  { %165 = vst.msk [vmem:[#allocation3 + $0x8] sm:$0xff] %vm25_vm0, %v163_v2 }
 0x140   :  { %178 = dma.vmem_to_hbm [thread:$0]  %s171_s11, 256, %s173_s14, [#allocation4], %s246_s4, %s246_s4, %s247_s15  }
 0x141   :  { %242 = dma.done.wait [#allocation4], 256  }
 0x142   :  { %243 = vsyncadd [#allocation4], 4294967040 }
 0x143   :  { %183 = vsyncpa [#allocation4], 1 }

</bundles_post_ra>
